<compile_context>
chip_gen: v7x
topology: tpu7x:2x2x1
jax: 0.10.0
libtpu: 0.0.40
codegen_flags: <defaults>
</compile_context>

<pallas_src>
import jax
import jax.numpy as jnp
from jax.experimental import pallas as pl
from jax.experimental.pallas import tpu as pltpu


def _round_up(x, m):
    return ((x + m - 1) // m) * m


def _patch_embed_kernel(x_ref, w_ref, b_ref, o_ref):
    """One (batch, patch-tile) grid step.

    x_ref: (1, Cin, tp, P)  input patches for this batch/tile (f32)
    w_ref: (Cin, P, Dp)     Conv1d weight per channel (bf16), VMEM-resident
    b_ref: (1, Dp)          bias (f32)
    o_ref: (1, tp, Dp)      output tile (lane-dense: Dp % 128 == 0)
    """
    cin = x_ref.shape[1]
    # Per-channel accumulation == Conv1d with kernel_size == stride == P.
    # x tiles are cast to bf16 in VMEM (MXU-native path) with f32 accumulation.
    acc = jnp.dot(
        x_ref[0, 0].astype(jnp.bfloat16), w_ref[0],
        preferred_element_type=jnp.float32,
    )
    for c in range(1, cin):  # static unroll over channels
        acc = acc + jnp.dot(
            x_ref[0, c].astype(jnp.bfloat16), w_ref[c],
            preferred_element_type=jnp.float32,
        )
    o_ref[0] = (acc + b_ref[...]).astype(o_ref.dtype)


def patch_embed_waveform(x, weight, bias, *, patch_size, max_patch_tile=512):
    """x: (B, Cin, T) f32; weight: (D, Cin, P); bias: (D,) -> (B, T // P, D)."""
    B, Cin, T = x.shape
    D = weight.shape[0]
    P = patch_size
    num_patches = T // P

    # Conv1d with stride == P drops any trailing remainder of T.
    if T != num_patches * P:
        x = x[:, :, : num_patches * P]

    # Contiguous reshape only (no transpose -> no extra HBM round-trip).
    xr = x.reshape(B, Cin, num_patches, P)

    # Lane-dense output: pad D to a multiple of 128 (no-op for D = 768 etc.).
    Dp = max(_round_up(D, 128), 128)

    # Patch tile: as many matmul rows per grid step as possible (multiple of 8,
    # capped so VMEM stays bounded for very long waveforms).
    tp = min(_round_up(num_patches, 8), max_patch_tile)
    n_tiles = pl.cdiv(num_patches, tp)
    np_pad = n_tiles * tp
    if np_pad != num_patches:
        xr = jnp.pad(xr, ((0, 0), (0, 0), (0, np_pad - num_patches), (0, 0)))

    # Weight -> (Cin, P, Dp) bf16, bias -> (1, Dp) f32 (tiny, one-time cost).
    w = jnp.transpose(weight, (1, 2, 0))  # (Cin, P, D)
    if Dp != D:
        w = jnp.pad(w, ((0, 0), (0, 0), (0, Dp - D)))
        b = jnp.pad(bias, (0, Dp - D))
    else:
        b = bias
    w = w.astype(jnp.bfloat16)
    b = b.reshape(1, Dp).astype(jnp.float32)

    out = pl.pallas_call(
        _patch_embed_kernel,
        out_shape=jax.ShapeDtypeStruct((B, np_pad, Dp), x.dtype),
        grid_spec=pl.GridSpec(
            grid=(B, n_tiles),
            in_specs=[
                # Per (batch, tile): contiguous tp*P run of samples per channel.
                pl.BlockSpec((1, Cin, tp, P), lambda bi, ti: (bi, 0, ti, 0)),
                # Full weight / bias, constant index -> resident across steps.
                pl.BlockSpec((Cin, P, Dp), lambda bi, ti: (0, 0, 0)),
                pl.BlockSpec((1, Dp), lambda bi, ti: (0, 0)),
            ],
            out_specs=pl.BlockSpec((1, tp, Dp), lambda bi, ti: (bi, ti, 0)),
        ),
        compiler_params=pltpu.CompilerParams(
            dimension_semantics=("parallel", "parallel"),
            # Above the 16 MiB (v5e) / 32 MiB (v6e, v7x) scoped defaults,
            # safely below v7x's 64 MiB physical VMEM.
            vmem_limit_bytes=48 * 1024 * 1024,
        ),
    )(xr, w, b)

    # Strip padding (no-op when num_patches % 8 == 0 and D % 128 == 0).
    return out[:, :num_patches, :D]


if __name__ == "__main__":
    # Small shapes consistent with the module: B=2, in_chans=4, img_size(T)=128,
    # patch_size=8, embed_dim=32  ->  num_patches = 16, output (2, 16, 32).
    B, Cin, T = 2, 4, 128
    P, D = 8, 32

    key = jax.random.PRNGKey(0)
    kx, kw, kb = jax.random.split(key, 3)
    x = jax.random.normal(kx, (B, Cin, T), dtype=jnp.float32)
    weight = jax.random.normal(kw, (D, Cin, P), dtype=jnp.float32) * 0.02
    bias = jax.random.normal(kb, (D,), dtype=jnp.float32) * 0.02

    out = patch_embed_waveform(x, weight, bias, patch_size=P)
    jax.block_until_ready(out)

    # Reference: Conv1d(kernel=stride=P) as a patch matmul, full f32.
    patches_ref = (
        x.reshape(B, Cin, T // P, P).transpose(0, 2, 1, 3).reshape(B * (T // P), Cin * P)
    )
    ref = (patches_ref @ weight.reshape(D, Cin * P).T + bias).reshape(B, T // P, D)

    assert out.shape == (B, T // P, D)
    # bf16 MXU operands with f32 accumulation -> relaxed tolerance.
    assert jnp.allclose(out, ref, atol=1e-2, rtol=1e-2), float(
        jnp.max(jnp.abs(out - ref))
    )

    print("KERNEL_OK")
</pallas_src>

<mosaic_0001>
module attributes {stable_mosaic.version = 11 : i64} {
  func.func @_patch_embed_kernel(%arg0: i32, %arg1: i32, %arg2: memref<1x4x16x8xf32, #tpu.memory_space<vmem>>, %arg3: memref<4x8x128xbf16, #tpu.memory_space<vmem>>, %arg4: memref<1x128xf32, #tpu.memory_space<vmem>>, %arg5: memref<1x16x128xf32, #tpu.memory_space<vmem>>) attributes {dimension_semantics = [#tpu.dimension_semantics<parallel>, #tpu.dimension_semantics<parallel>], iteration_bounds = array<i64: 2, 1>, scalar_prefetch = 0 : i64, scratch_operands = 0 : i64, tpu.core_type = #tpu.core_type<tc>, window_params = [{transform_indices = @transform_0, window_bounds = array<i64: 1, 4, 16, 8>}, {pipeline_mode = #tpu.pipeline_mode<synchronous>, transform_indices = @transform_1, window_bounds = array<i64: 4, 8, 128>}, {pipeline_mode = #tpu.pipeline_mode<synchronous>, transform_indices = @transform_2, window_bounds = array<i64: 1, 128>}, {transform_indices = @transform_3, window_bounds = array<i64: 1, 16, 128>}]} {
    %c0 = arith.constant 0 : index
    %c0_0 = arith.constant 0 : index
    %c0_1 = arith.constant 0 : index
    %c0_2 = arith.constant 0 : index
    %0 = vector.load %arg2[%c0, %c0_0, %c0_1, %c0_2] : memref<1x4x16x8xf32, #tpu.memory_space<vmem>>, vector<1x1x16x8xf32>
    %1 = vector.shape_cast %0 : vector<1x1x16x8xf32> to vector<16x8xf32>
    %2 = arith.truncf %1 : vector<16x8xf32> to vector<16x8xbf16>
    %c0_3 = arith.constant 0 : index
    %c0_4 = arith.constant 0 : index
    %c0_5 = arith.constant 0 : index
    %3 = vector.load %arg3[%c0_3, %c0_4, %c0_5] : memref<4x8x128xbf16, #tpu.memory_space<vmem>>, vector<1x8x128xbf16>
    %4 = vector.shape_cast %3 : vector<1x8x128xbf16> to vector<8x128xbf16>
    %cst = arith.constant dense<0.000000e+00> : vector<16x128xf32>
    %5 = tpu.matmul %2, %4, %cst {dimension_numbers = #tpu.dot_dimension_numbers<[1], [0], [0], [1], [0, 0, 1, 1], [], []>} : vector<16x8xbf16>, vector<8x128xbf16>, vector<16x128xf32> -> vector<16x128xf32>
    %c0_6 = arith.constant 0 : index
    %c1 = arith.constant 1 : index
    %c0_7 = arith.constant 0 : index
    %c0_8 = arith.constant 0 : index
    %6 = vector.load %arg2[%c0_6, %c1, %c0_7, %c0_8] : memref<1x4x16x8xf32, #tpu.memory_space<vmem>>, vector<1x1x16x8xf32>
    %7 = vector.shape_cast %6 : vector<1x1x16x8xf32> to vector<16x8xf32>
    %8 = arith.truncf %7 : vector<16x8xf32> to vector<16x8xbf16>
    %c1_9 = arith.constant 1 : index
    %c0_10 = arith.constant 0 : index
    %c0_11 = arith.constant 0 : index
    %9 = vector.load %arg3[%c1_9, %c0_10, %c0_11] : memref<4x8x128xbf16, #tpu.memory_space<vmem>>, vector<1x8x128xbf16>
    %10 = vector.shape_cast %9 : vector<1x8x128xbf16> to vector<8x128xbf16>
    %cst_12 = arith.constant dense<0.000000e+00> : vector<16x128xf32>
    %11 = tpu.matmul %8, %10, %cst_12 {dimension_numbers = #tpu.dot_dimension_numbers<[1], [0], [0], [1], [0, 0, 1, 1], [], []>} : vector<16x8xbf16>, vector<8x128xbf16>, vector<16x128xf32> -> vector<16x128xf32>
    %12 = arith.addf %5, %11 : vector<16x128xf32>
    %c0_13 = arith.constant 0 : index
    %c2 = arith.constant 2 : index
    %c0_14 = arith.constant 0 : index
    %c0_15 = arith.constant 0 : index
    %13 = vector.load %arg2[%c0_13, %c2, %c0_14, %c0_15] : memref<1x4x16x8xf32, #tpu.memory_space<vmem>>, vector<1x1x16x8xf32>
    %14 = vector.shape_cast %13 : vector<1x1x16x8xf32> to vector<16x8xf32>
    %15 = arith.truncf %14 : vector<16x8xf32> to vector<16x8xbf16>
    %c2_16 = arith.constant 2 : index
    %c0_17 = arith.constant 0 : index
    %c0_18 = arith.constant 0 : index
    %16 = vector.load %arg3[%c2_16, %c0_17, %c0_18] : memref<4x8x128xbf16, #tpu.memory_space<vmem>>, vector<1x8x128xbf16>
    %17 = vector.shape_cast %16 : vector<1x8x128xbf16> to vector<8x128xbf16>
    %cst_19 = arith.constant dense<0.000000e+00> : vector<16x128xf32>
    %18 = tpu.matmul %15, %17, %cst_19 {dimension_numbers = #tpu.dot_dimension_numbers<[1], [0], [0], [1], [0, 0, 1, 1], [], []>} : vector<16x8xbf16>, vector<8x128xbf16>, vector<16x128xf32> -> vector<16x128xf32>
    %19 = arith.addf %12, %18 : vector<16x128xf32>
    %c0_20 = arith.constant 0 : index
    %c3 = arith.constant 3 : index
    %c0_21 = arith.constant 0 : index
    %c0_22 = arith.constant 0 : index
    %20 = vector.load %arg2[%c0_20, %c3, %c0_21, %c0_22] : memref<1x4x16x8xf32, #tpu.memory_space<vmem>>, vector<1x1x16x8xf32>
    %21 = vector.shape_cast %20 : vector<1x1x16x8xf32> to vector<16x8xf32>
    %22 = arith.truncf %21 : vector<16x8xf32> to vector<16x8xbf16>
    %c3_23 = arith.constant 3 : index
    %c0_24 = arith.constant 0 : index
    %c0_25 = arith.constant 0 : index
    %23 = vector.load %arg3[%c3_23, %c0_24, %c0_25] : memref<4x8x128xbf16, #tpu.memory_space<vmem>>, vector<1x8x128xbf16>
    %24 = vector.shape_cast %23 : vector<1x8x128xbf16> to vector<8x128xbf16>
    %cst_26 = arith.constant dense<0.000000e+00> : vector<16x128xf32>
    %25 = tpu.matmul %22, %24, %cst_26 {dimension_numbers = #tpu.dot_dimension_numbers<[1], [0], [0], [1], [0, 0, 1, 1], [], []>} : vector<16x8xbf16>, vector<8x128xbf16>, vector<16x128xf32> -> vector<16x128xf32>
    %26 = arith.addf %19, %25 : vector<16x128xf32>
    %c0_27 = arith.constant 0 : index
    %c0_28 = arith.constant 0 : index
    %27 = vector.load %arg4[%c0_27, %c0_28] : memref<1x128xf32, #tpu.memory_space<vmem>>, vector<1x128xf32>
    %28 = vector.broadcast %27 : vector<1x128xf32> to vector<16x128xf32>
    %29 = arith.addf %26, %28 : vector<16x128xf32>
    %c0_29 = arith.constant 0 : index
    %c0_30 = arith.constant 0 : index
    %c0_31 = arith.constant 0 : index
    %30 = vector.load %arg5[%c0_29, %c0_30, %c0_31] : memref<1x16x128xf32, #tpu.memory_space<vmem>>, vector<1x16x128xf32>
    %31 = vector.shape_cast %30 : vector<1x16x128xf32> to vector<16x128xf32>
    %32 = vector.shape_cast %29 : vector<16x128xf32> to vector<1x16x128xf32>
    tpu.vector_store %arg5[%c0_29, %c0_30, %c0_31], %32 {strides = array<i32>} : memref<1x16x128xf32, #tpu.memory_space<vmem>>, vector<1x16x128xf32>,
    return
  }
  func.func @transform_0(%arg0: i32, %arg1: i32) -> (i32, i32, i32, i32) {
    %c0_i32 = arith.constant 0 : i32
    %c0_i32_0 = arith.constant 0 : i32
    %c0_i32_1 = arith.constant 0 : i32
    return %arg0, %c0_i32, %arg1, %c0_i32_0 : i32, i32, i32, i32
  }
  func.func @transform_1(%arg0: i32, %arg1: i32) -> (i32, i32, i32) {
    %c0_i32 = arith.constant 0 : i32
    %c0_i32_0 = arith.constant 0 : i32
    %c0_i32_1 = arith.constant 0 : i32
    %c0_i32_2 = arith.constant 0 : i32
    return %c0_i32, %c0_i32_0, %c0_i32_1 : i32, i32, i32
  }
  func.func @transform_2(%arg0: i32, %arg1: i32) -> (i32, i32) {
    %c0_i32 = arith.constant 0 : i32
    %c0_i32_0 = arith.constant 0 : i32
    %c0_i32_1 = arith.constant 0 : i32
    return %c0_i32, %c0_i32_0 : i32, i32
  }
  func.func @transform_3(%arg0: i32, %arg1: i32) -> (i32, i32, i32) {
    %c0_i32 = arith.constant 0 : i32
    %c0_i32_0 = arith.constant 0 : i32
    return %arg0, %arg1, %c0_i32 : i32, i32, i32
  }
}

</mosaic_0001>

<bundles_post_ra>
// kernel: tpu_custom_call.1
= control target key start
LH: loop header
LB: loop body
LE: loop exit
PB: predicated region body
PF: predicated region fallthrough
CT: control target
= control target key end

     0   :  { %8 = vsyncpa [#allocation3], 0  ;;  %s890_s0 = inlined_call_operand.vmem [shape: f32[2,4,16,8], index: 0, kind: input, shape index: {}]   ;;  %s891_s1 = inlined_call_operand.vmem [shape: bf16[4,8,128], index: 1, kind: input, shape index: {}]   ;;  %s892_s2 = inlined_call_operand.vmem [shape: f32[1,128], index: 2, kind: input, shape index: {}]   ;;  %s893_s3 = inlined_call_operand.hbm [shape: f32[2,16,128], index: 3, kind: output, shape index: {}]  }
   0x1   :  { %10 = vsyncpa [#allocation3 + $0x1], 0  ;;  %s748_s12 = smov 0   ;;  %s750_s13 = smov 0  }
   0x2   :  { %s752_s14 = smov 0   ;;  %s754_s15 = smov 0  }
   0x3   :  { %s756_s16 = smov 0   ;;  %s758_s17 = smov 0  }
   0x4 LB: > { %s523_s18 = sadd.s32 4294967295, %s721_s17   ;;  %s524_s19 = sadd.s32 4294967294, %s721_s17   ;;  %s721_s17 = sphi %s758_s17, %s16_s17   ;;  %s717_s16 = sphi %s756_s16, %s900_s16   ;;  %s713_s15 = sphi %s754_s15, %s899_s15   ;;  %s709_s14 = sphi %s752_s14, %s898_s14   ;;  %s705_s13 = sphi %s750_s13, %s897_s13   ;;  %s701_s12 = sphi %s748_s12, %s896_s12  }
   0x5   : > { %s28_s20 = sadd.s32 1, %s717_s16  ;;  %s107_s21 = sadd.s32 1, %s709_s14 }
   0x6   : > { %p30_p0 = scmp.ge.s32.totalorder %s28_s20, 2  ;;  %p117_p1 = scmp.ne.s32.totalorder %s709_s14, %s705_s13 }
   0x7   : > { %p118_p2 = scmp.eq.s32.totalorder %s523_s18, 1  ;;  %p123_p3 = scmp.ne.s32.totalorder %s705_s13, %s701_s12 }
   0x8   : > { %s902_s20 = smov (%p30_p0, %s28_s20), 0  ;;  %p124_p5 = scmp.eq.s32.totalorder %s524_s19, 1 }
   0x9   : > { %p788_p4 = por %p118_p2, %p117_p1  ;;  %s102_s23 = ssub.s32 %s717_s16, %s902_s20 }
   0xa   : > { %p527_p6 = scmp.ge.s32.totalorder %s721_s17, 1  ;;  %p105_p7 = scmp.eq.s32.totalorder %s102_s23, 0 }
   0xb   : > { %p795_p8 = por %p124_p5, %p123_p3  ;;  %p161_p9 = scmp.lt.s32.totalorder %s721_s17, 3 }
   0xc   : > { %s801_s25 = scalar_select %p105_p7, %s709_s14, %s107_s21  }
   0xd   : > { %p162_p10 = pnand %p527_p6, %p161_p9 }
   0xe   : > { %v533_v0 = vld [vmem:[%s891_s1 + $0x4] sm:$0xf] (!%p162_p10)  ;;  %vm215_vm0 = vcmask (!%p162_p10), 1043456   ;;  %v204_v1 = vld [vmem:[%s891_s1] sm:$0xf] (!%p162_p10)  ;;  %v723_v2 = vmov (!%p162_p10), 0.0  }
   0xf   : > { %165 = sbr.rel (%p162_p10) target bundleno = 272 (0x110), region = 32  ;;  %560 = vmatprep.subr.bf16.mxu0 (!%p162_p10), %v723_v2  ;;  %v217_v3 = vsel (!%p162_p10), %vm215_vm0, %v533_v0, 0  ;;  %566 = vmatprep.subr.bf16.mxu1 (!%p162_p10), %v723_v2  ;;  %v264_v4 = vsel (!%p162_p10), %vm215_vm0, %v204_v1, 0  ;;  %p190_p11 = scmp.lt.s32.totalorder (!%p162_p10), %s713_s15, 1  ;;  %vm724_vm1 = vmmov (!%p162_p10), 0   ;;  %vm211_vm2 = vcmask (!%p162_p10), 64512  }
  0x10   : > { %561 = vmatpush3.bf16.msra.mxu0 (!%p162_p10), %v217_v3  ;;  %567 = vmatpush3.bf16.msra.mxu1 (!%p162_p10), %v264_v4  ;;  %v538_v5 = vld [vmem:[%s891_s1 + $0x8] sm:$0xf] (!%p162_p10)  ;;  %v542_v6 = vld [vmem:[%s891_s1 + $0xc] sm:$0xf] (!%p162_p10)  ;;  %s186_s18 = sand.u32 (!%p162_p10), 1, %s705_s13   ;;  %s551_s28 = sshll.u32 (!%p162_p10), %s713_s15, 8 }
  0x11   : > { %562 = vmatprep.mubr.msk.bf16.mxu0 (!%p162_p10), %vm724_vm1, %v723_v2  ;;  %568 = vmatprep.mubr.msk.bf16.mxu1 (!%p162_p10), %vm724_vm1, %v723_v2  ;;  %v317_v12 = vsel (!%p162_p10), %vm215_vm0, %v538_v5, 0  ;;  %v372_v14 = vsel (!%p162_p10), %vm215_vm0, %v542_v6, 0  ;;  %s528_s19 = sshll.u32 (!%p162_p10), %s186_s18, 4  ;;  %v544_v35 = vld [vmem:[%s892_s2] ss:$0 sm:$0xff] (!%p162_p10)  ;;  %s844_s5 = scalar_lea.sflag (!%p162_p10), [#allocation3], %s186_s18 }
  0x12   : > { %572 = vmatprep.subr.bf16.mxu0 (!%p162_p10), %v723_v2  ;;  %578 = vmatprep.subr.bf16.mxu1 (!%p162_p10), %v723_v2  ;;  %s188_s26 = scalar_lea.vmem (!%p162_p10), [#allocation2], %s528_s19 }
  0x13   : > { %s444_s27 = sshll.u32 (!%p162_p10), %s188_s26, 4  ;;  %s837_s27 = int_to_ptr.vmem [resolvable:$true] %s444_s27 }
  0x14   : > { %s643_s6 = scalar_lea.vmem (!%p162_p10), %s837_s27, 256 }
  0x15   : > { %p644_p12 = scmp.ne.s32.totalorder (!%p162_p10), %s837_s27, %s643_s6 }
  0x16   : > { %s191_s30 = scalar_select %p190_p11, %s713_s15, 1 }
  0x17   : > { %p645_p13 = pnand %p644_p12, %p788_p4  ;;  %s725_s15 = smov [#allocation2]  }
  0x18   : > { %s550_s4 = sshll.u32 %s191_s30, 6  ;;  %s647_s7 = sshll.u32 %s725_s15, 4  ;;  %s648_s7 = int_to_ptr.vmem [resolvable:$false] %s647_s7 }
  0x19   : > { %s197_s9 = scalar_lea.vmem %s890_s0, %s550_s4  ;;  %s842_s4 = scalar_lea.hbm %s893_s3, %s551_s28 }
  0x1a   : > { %v531_v7 = vld [vmem:[%s197_s9 + $0x10] sm:$0xff]  ;;  %v532_v8 = vld [vmem:[%s197_s9 + $0x18] sm:$0xff]  ;;  %v201_v9 = vld [vmem:[%s197_s9] sm:$0xff]  ;;  %p646_p0 = pneg %p645_p13  ;;  %s649_s8 = scalar_lea.vmem %s648_s7, 512 }
  0x1b   : > { %v208_v10 = vpack.c.bf16 %v532_v8, %v531_v7  ;;  %v202_v11 = vld [vmem:[%s197_s9 + $0x8] sm:$0xff]  ;;  %v536_v15 = vld [vmem:[%s197_s9 + $0x20] sm:$0xff]  ;;  %v540_v17 = vld [vmem:[%s197_s9 + $0x30] sm:$0xff]  ;;  %p650_p1 = scmp.lt.s32.totalorder %s837_s27, %s648_s7  ;;  %p651_p2 = scmp.lt.s32.totalorder %s649_s8, %s643_s6 }
  0x1c   : > { %v203_v13 = vpack.c.bf16 %v202_v11, %v201_v9  ;;  %v537_v16 = vld [vmem:[%s197_s9 + $0x28] sm:$0xff]  ;;  %v541_v18 = vld [vmem:[%s197_s9 + $0x38] sm:$0xff] }
  0x1d   : > { %563 = vmatmul.mubr.msk.bf16.vlgmr.msra.gmra.mrb[0].mxu0 %vm211_vm2, %v208_v10  ;;  %v310_v19 = vpack.c.bf16 %v537_v16, %v536_v15  ;;  %v365_v20 = vpack.c.bf16 %v541_v18, %v540_v17  ;;  %p652_p3 = por %p651_p2, %p650_p1 }
  0x1e   : > { %569 = vmatmul.mubr.msk.bf16.vlgmr.msra.gmra.mrb[0].mxu1 %vm211_vm2, %v203_v13  ;;  %573 = vmatpush3.bf16.msra.mxu0 %v317_v12 }
  0x1f   : > { %579 = vmatpush3.bf16.msra.mxu1 %v372_v14  ;;  %574 = vmatprep.mubr.msk.bf16.mxu0 %vm724_vm1, %v723_v2  ;;  %p653_p5 = pnand %p652_p3, %p646_p0 }
  0x20   : > { %580 = vmatprep.mubr.msk.bf16.mxu1 %vm724_vm1, %v723_v2 }
  0x25   : > { %575 = vmatmul.mubr.msk.bf16.vlgmr.msra.gmra.mrb[4].mxu0 %vm211_vm2, %v310_v19 }
  0x26   : > { %581 = vmatmul.mubr.msk.bf16.vlgmr.msra.gmra.mrb[4].mxu1 %vm211_vm2, %v365_v20 }
  0xf0   : > { %v253_v21 = vpop.f32.mrb[0].mxu0 }
  0xf1   : > { %v300_v22 = vpop.f32.mrb[0].mxu1  ;;  %v564_v23 = vpop.f32.mrb[1].mxu0 }
  0xf2   : > { %v301_v24 = vadd.f32 %v300_v22, %v253_v21  ;;  %v570_v25 = vpop.f32.mrb[1].mxu1  ;;  %v256_v26 = vpop.f32.mrb[2].mxu0 }
  0xf3   : > { %v303_v27 = vpop.f32.mrb[2].mxu1  ;;  %v565_v28 = vpop.f32.mrb[3].mxu0 }
  0xf4   : > { %v304_v29 = vadd.f32 %v303_v27, %v256_v26  ;;  %v571_v30 = vpop.f32.mrb[3].mxu1 }
  0xf8   : > { %v353_v31 = vpop.f32.mrb[4].mxu0 }
  0xf9   : > { %v360_v32 = vadd.f32 %v353_v31, %v301_v24  ;;  %v408_v33 = vpop.f32.mrb[4].mxu1  ;;  %v576_v34 = vpop.f32.mrb[5].mxu0 }
  0xfa   : > { %v582_v36 = vpop.f32.mrb[5].mxu1  ;;  %v356_v37 = vpop.f32.mrb[6].mxu0 }
  0xfb   : > { %v415_v38 = vadd.f32 %v408_v33, %v360_v32  ;;  %v361_v39 = vadd.f32 %v356_v37, %v304_v29  ;;  %v411_v40 = vpop.f32.mrb[6].mxu1  ;;  %v577_v41 = vpop.f32.mrb[7].mxu0 }
  0xfc   : > { %v583_v42 = vpop.f32.mrb[7].mxu1 }
  0xfd   : > { %v424_v43 = vadd.f32 %v544_v35, %v415_v38  ;;  %v416_v44 = vadd.f32 %v411_v40, %v361_v39 }
  0xff   : > { %426 = vst [vmem:[%s188_s26] sm:$0xff] %v424_v43  ;;  %v425_v45 = vadd.f32 %v544_v35, %v416_v44 }
 0x101   : > { %427 = vst [vmem:[%s188_s26 + $0x8] sm:$0xff] %v425_v45 }
 0x102   : > { %656 = shalt.err (!%p653_p5)
}
 0x103   : > { %s657_s9 = scalar_lea.hbm %s842_s4, 256  ;;  %s661_s18 = scalar_lea.hbm %s893_s3, 512 }
 0x104   : > { %p658_p6 = scmp.ne.s32.totalorder %s842_s4, %s657_s9  ;;  %p662_p10 = scmp.lt.u32.totalorder %s842_s4, %s893_s3 }
 0x105   : > { %p663_p11 = scmp.lt.u32.totalorder %s661_s18, %s657_s9  ;;  %p665_p13 = scmp.lt.u32.totalorder %s657_s9, %s842_s4 }
 0x106   : > { %p659_p7 = pnand %p658_p6, %p788_p4 }
 0x107   : > { %p664_p12 = por %p663_p11, %p662_p10 }
 0x108   : > { %p660_p9 = pneg %p659_p7 }
 0x109   : > { %p666_p0 = por %p665_p13, %p664_p12 }
 0x10b   : > { %p667_p1 = pnand %p666_p0, %p660_p9 }
 0x10d   : > { %670 = shalt.err (!%p667_p1)
}
 0x10e   : > { %s726_s23 = smov 128   ;;  %s727_s26 = smov 8  }
 0x10f   : > { %584 = dma.vmem_to_hbm [thread:$0]  (%p788_p4), %s837_s27, 256, %s842_s4, %s844_s5, %s726_s23, %s726_s23, %s727_s26  }
 0x110 PF: > { %p590_p2 = scmp.ge.s32.totalorder %s721_s17, 2  ;;  %s459_s28 = sand.u32 1, %s701_s12  }
 0x111   : > { %s460_s29 = scalar_lea.sflag [#allocation3], %s459_s28 }
 0x112   : > { %p587_p3 = pnand %p590_p2, %p795_p8 }
 0x114   : > { %696 = dma.done.wait (!%p587_p3), %s460_s29, 256  }
 0x115   : > { %698 = vsyncadd (!%p587_p3), %s460_s29, 4294967040  ;;  %s16_s17 = sadd.s32 1, %s721_s17   ;;  %s896_s12 = smov %s705_s13 }
 0x116   : > { %p13_p5 = scmp.ge.s32.totalorder %s16_s17, 4   ;;  %s897_s13 = smov %s709_s14 }
 0x117   : > { %s898_s14 = smov %s801_s25  ;;  %s899_s15 = smov %s717_s16 }
 0x118   : > { %s900_s16 = smov %s902_s20  ;;  %15 = sbr.rel (!%p13_p5) target bundleno = 4 (0x4), region = 73 }
 0x11f   :  { %465 = vsyncpa [#allocation3], 1 }
 0x120   :  { %467 = vsyncpa [#allocation3 + $0x1], 1 }

</bundles_post_ra>
